<compile_context>
chip_gen: v5e
topology: v5e:2x2
jax: 0.10.0
libtpu: 0.0.40
codegen_flags: <defaults>
</compile_context>

<pallas_src>
import functools

import jax
import jax.numpy as jnp
from jax.experimental import pallas as pl
from jax.experimental.pallas import tpu as pltpu

_LANE = 128  # TPU lane width


def _round_up(x, m):
    return ((x + m - 1) // m) * m


def _qnetwork_kernel(x_ref, w_ref, b_ref, o_ref, *, s_pad, off_w2, off_w3):
    cdt = w_ref.dtype                           # matmul dtype (bf16 or f32)

    x = x_ref[...].astype(cdt)                  # (TB, s_pad), tiny cast
    w1 = w_ref[0:s_pad, :]                      # (s_pad, 128), pre-cast slab
    w2 = w_ref[off_w2:off_w2 + _LANE, :]        # (128, 128)
    w3 = w_ref[off_w3:off_w3 + _LANE, :]        # (128, 128)
    b1 = b_ref[0:1]                             # (1, 128) f32
    b2 = b_ref[1:2]
    b3 = b_ref[2:3]

    # fc1 + relu (MXU matmul, f32 accumulation, f32 elementwise)
    h1 = jnp.dot(x, w1, preferred_element_type=jnp.float32) + b1
    h1 = jnp.maximum(h1, 0.0)
    # fc2 + relu
    h2 = jnp.dot(h1.astype(cdt), w2, preferred_element_type=jnp.float32) + b2
    h2 = jnp.maximum(h2, 0.0)
    # fc3 (no activation); only the first a_pad lanes are written back.
    out = jnp.dot(h2.astype(cdt), w3, preferred_element_type=jnp.float32) + b3
    o_ref[...] = out[:, :o_ref.shape[1]].astype(o_ref.dtype)


def pack_qnetwork_params(params, state_size, *, use_bf16=True):
    """Pack w1,w2,w3 into one lane-padded (rows, 128) slab (pre-cast to the
    matmul dtype) plus an f32 (8, 128) bias tile."""
    H = params["w1"].shape[1]
    A = params["w3"].shape[1]
    assert H <= _LANE and A <= _LANE
    S = state_size
    s_pad = _round_up(max(S, 1), 8)
    wdt = jnp.bfloat16 if use_bf16 else jnp.float32

    w1 = jnp.zeros((s_pad, _LANE), jnp.float32).at[:S, :H].set(params["w1"])
    w2 = jnp.zeros((_LANE, _LANE), jnp.float32).at[:H, :H].set(params["w2"])
    w3 = jnp.zeros((_LANE, _LANE), jnp.float32).at[:H, :A].set(params["w3"])
    slab = jnp.concatenate([w1, w2, w3], axis=0).astype(wdt)  # (s_pad+256, 128)

    biases = jnp.zeros((8, _LANE), jnp.float32)
    biases = biases.at[0, :H].set(params["b1"].reshape(-1))
    biases = biases.at[1, :H].set(params["b2"].reshape(-1))
    biases = biases.at[2, :A].set(params["b3"].reshape(-1))

    offsets = {"s_pad": s_pad, "off_w2": s_pad, "off_w3": s_pad + _LANE}
    return slab, biases, offsets


def qnetwork_forward(state, params, *, block_b=1024, use_bf16=True):
    """state: (B, state_size) f32; params: dict of w1,b1,w2,b2,w3,b3."""
    B, S = state.shape
    A = params["w3"].shape[1]

    slab, biases, off = pack_qnetwork_params(params, S, use_bf16=use_bf16)
    s_pad = off["s_pad"]
    a_pad = _round_up(A, 8)            # 8-lane output pad (not 128)

    # Batch tiling: up to block_b rows per grid step (multiple of 8); cap so
    # the grid has >= 2 steps whenever possible (v7x megacore; neutral on
    # v5e/v6e since the axis is "parallel").
    b_al = _round_up(B, 8)
    tb = min(_round_up(block_b, 8), b_al)
    if b_al > 8 and b_al <= tb:
        tb = _round_up((b_al + 1) // 2, 8)
    b_pad = _round_up(B, tb)

    # Skip the zero-pad copy when the batch/feature dims already align.
    if b_pad == B and s_pad == S:
        x = state
    else:
        x = jnp.zeros((b_pad, s_pad), jnp.float32).at[:B, :S].set(state)

    grid = (b_pad // tb,)
    kernel = functools.partial(_qnetwork_kernel, s_pad=s_pad,
                               off_w2=off["off_w2"], off_w3=off["off_w3"])

    flops = 2 * b_pad * (s_pad * _LANE + _LANE * _LANE + _LANE * _LANE)
    bytes_accessed = (x.size * x.dtype.itemsize
                      + slab.size * slab.dtype.itemsize
                      + biases.size * 4
                      + b_pad * a_pad * 4)

    out_padded = pl.pallas_call(
        kernel,
        out_shape=jax.ShapeDtypeStruct((b_pad, a_pad), jnp.float32),
        grid_spec=pltpu.PrefetchScalarGridSpec(
            num_scalar_prefetch=0,
            grid=grid,
            in_specs=[
                pl.BlockSpec((tb, s_pad), lambda i: (i, 0)),   # state tile (pipelined)
                pl.BlockSpec(slab.shape, lambda i: (0, 0)),    # weights resident in VMEM
                pl.BlockSpec(biases.shape, lambda i: (0, 0)),  # f32 biases resident
            ],
            out_specs=pl.BlockSpec((tb, a_pad), lambda i: (i, 0)),
        ),
        compiler_params=pltpu.CompilerParams(
            dimension_semantics=("parallel",)),
        cost_estimate=pl.CostEstimate(
            flops=flops, transcendentals=0, bytes_accessed=bytes_accessed),
    )(x, slab, biases)

    if b_pad == B and a_pad == A:
        return out_padded
    if b_pad == B:
        return out_padded[:, :A]
    return out_padded[:B, :A]


def init_qnetwork_params(key, state_size, action_size):
    """Deterministic init matching nn.Linear's default U(-1/sqrt(fan_in), 1/sqrt(fan_in))."""
    def linear(key, fan_in, fan_out):
        kw, kb = jax.random.split(key)
        bound = 1.0 / jnp.sqrt(jnp.float32(fan_in))
        # stored as (in, out): transpose of PyTorch's (out, in) weight
        w = jax.random.uniform(kw, (fan_in, fan_out), jnp.float32, -bound, bound)
        b = jax.random.uniform(kb, (1, fan_out), jnp.float32, -bound, bound)
        return w, b

    k1, k2, k3 = jax.random.split(key, 3)
    w1, b1 = linear(k1, state_size, 64)
    w2, b2 = linear(k2, 64, 64)
    w3, b3 = linear(k3, 64, action_size)
    return {"w1": w1, "b1": b1, "w2": w2, "b2": b2, "w3": w3, "b3": b3}


def qnetwork_reference(state, params):
    h1 = jnp.maximum(state @ params["w1"] + params["b1"], 0.0)
    h2 = jnp.maximum(h1 @ params["w2"] + params["b2"], 0.0)
    return h2 @ params["w3"] + params["b3"]


if __name__ == "__main__":
    STATE_SIZE = 8      # LunarLander-v2 observation dim
    ACTION_SIZE = 4     # LunarLander-v2 action dim
    BATCH = 8

    key = jax.random.PRNGKey(0)
    k_params, k_s1, k_s2, k_s3 = jax.random.split(key, 4)
    params = init_qnetwork_params(k_params, STATE_SIZE, ACTION_SIZE)

    state = jax.random.normal(k_s1, (BATCH, STATE_SIZE), jnp.float32)
    ref = qnetwork_reference(state, params)

    # Exact-semantics path (f32 matmul inputs, test-only).
    out_f32 = jax.block_until_ready(qnetwork_forward(state, params, use_bf16=False))
    assert out_f32.shape == (BATCH, ACTION_SIZE)
    assert jnp.allclose(out_f32, ref, atol=1e-5, rtol=1e-5)

    # Production bf16-MXU path (f32 accumulation / f32 bias+ReLU).
    out_bf16 = jax.block_until_ready(qnetwork_forward(state, params))
    assert out_bf16.shape == (BATCH, ACTION_SIZE)
    assert jnp.allclose(out_bf16, ref, atol=2e-2, rtol=2e-2)

    # Ragged batch (not a multiple of the tile) -> padded multi-tile grid.
    state2 = jax.random.normal(k_s2, (40, STATE_SIZE), jnp.float32)
    out2 = jax.block_until_ready(
        qnetwork_forward(state2, params, block_b=16, use_bf16=False))
    assert out2.shape == (40, ACTION_SIZE)
    assert jnp.allclose(out2, qnetwork_reference(state2, params),
                        atol=1e-5, rtol=1e-5)

    # Aligned batch, default settings: no input pad, >= 2 grid steps (v7x path).
    state3 = jax.random.normal(k_s3, (256, STATE_SIZE), jnp.float32)
    out3 = jax.block_until_ready(qnetwork_forward(state3, params))
    assert out3.shape == (256, ACTION_SIZE)
    assert jnp.allclose(out3, qnetwork_reference(state3, params),
                        atol=5e-2, rtol=5e-2)

    print("KERNEL_OK")
</pallas_src>

<mosaic_0001>
module attributes {stable_mosaic.version = 11 : i64} {
  func.func @_qnetwork_kernel(%arg0: i32, %arg1: memref<8x8xf32, #tpu.memory_space<vmem>>, %arg2: memref<264x128xf32, #tpu.memory_space<vmem>>, %arg3: memref<8x128xf32, #tpu.memory_space<vmem>>, %arg4: memref<8x8xf32, #tpu.memory_space<vmem>>) attributes {dimension_semantics = [#tpu.dimension_semantics<parallel>], iteration_bounds = array<i64: 1>, scalar_prefetch = 0 : i64, scratch_operands = 0 : i64, tpu.core_type = #tpu.core_type<tc>, window_params = [{transform_indices = @transform_0, window_bounds = array<i64: 8, 8>}, {pipeline_mode = #tpu.pipeline_mode<synchronous>, transform_indices = @transform_1, window_bounds = array<i64: 264, 128>}, {pipeline_mode = #tpu.pipeline_mode<synchronous>, transform_indices = @transform_2, window_bounds = array<i64: 8, 128>}, {transform_indices = @transform_3, window_bounds = array<i64: 8, 8>}]} {
    %c0 = arith.constant 0 : index
    %c0_0 = arith.constant 0 : index
    %0 = vector.load %arg1[%c0, %c0_0] : memref<8x8xf32, #tpu.memory_space<vmem>>, vector<8x8xf32>
    %c0_1 = arith.constant 0 : index
    %c0_2 = arith.constant 0 : index
    %1 = vector.load %arg2[%c0_1, %c0_2] : memref<264x128xf32, #tpu.memory_space<vmem>>, vector<8x128xf32>
    %c8 = arith.constant 8 : index
    %c0_3 = arith.constant 0 : index
    %2 = vector.load %arg2[%c8, %c0_3] : memref<264x128xf32, #tpu.memory_space<vmem>>, vector<128x128xf32>
    %c136 = arith.constant 136 : index
    %c0_4 = arith.constant 0 : index
    %3 = vector.load %arg2[%c136, %c0_4] : memref<264x128xf32, #tpu.memory_space<vmem>>, vector<128x128xf32>
    %c0_5 = arith.constant 0 : index
    %c0_6 = arith.constant 0 : index
    %4 = vector.load %arg3[%c0_5, %c0_6] : memref<8x128xf32, #tpu.memory_space<vmem>>, vector<1x128xf32>
    %c1 = arith.constant 1 : index
    %c0_7 = arith.constant 0 : index
    %5 = vector.load %arg3[%c1, %c0_7] : memref<8x128xf32, #tpu.memory_space<vmem>>, vector<1x128xf32>
    %c2 = arith.constant 2 : index
    %c0_8 = arith.constant 0 : index
    %6 = vector.load %arg3[%c2, %c0_8] : memref<8x128xf32, #tpu.memory_space<vmem>>, vector<1x128xf32>
    %cst = arith.constant dense<0.000000e+00> : vector<8x128xf32>
    %7 = tpu.matmul %0, %1, %cst {dimension_numbers = #tpu.dot_dimension_numbers<[1], [0], [0], [1], [0, 0, 1, 1], [], []>} : vector<8x8xf32>, vector<8x128xf32>, vector<8x128xf32> -> vector<8x128xf32>
    %8 = vector.broadcast %4 : vector<1x128xf32> to vector<8x128xf32>
    %9 = arith.addf %7, %8 : vector<8x128xf32>
    %cst_9 = arith.constant 0.000000e+00 : f32
    %10 = vector.broadcast %cst_9 : f32 to vector<8x128xf32>
    %11 = arith.maximumf %9, %10 : vector<8x128xf32>
    %cst_10 = arith.constant dense<0.000000e+00> : vector<8x128xf32>
    %12 = tpu.matmul %11, %2, %cst_10 {dimension_numbers = #tpu.dot_dimension_numbers<[1], [0], [0], [1], [0, 0, 1, 1], [], []>} : vector<8x128xf32>, vector<128x128xf32>, vector<8x128xf32> -> vector<8x128xf32>
    %13 = vector.broadcast %5 : vector<1x128xf32> to vector<8x128xf32>
    %14 = arith.addf %12, %13 : vector<8x128xf32>
    %cst_11 = arith.constant 0.000000e+00 : f32
    %15 = vector.broadcast %cst_11 : f32 to vector<8x128xf32>
    %16 = arith.maximumf %14, %15 : vector<8x128xf32>
    %cst_12 = arith.constant dense<0.000000e+00> : vector<8x128xf32>
    %17 = tpu.matmul %16, %3, %cst_12 {dimension_numbers = #tpu.dot_dimension_numbers<[1], [0], [0], [1], [0, 0, 1, 1], [], []>} : vector<8x128xf32>, vector<128x128xf32>, vector<8x128xf32> -> vector<8x128xf32>
    %18 = vector.broadcast %6 : vector<1x128xf32> to vector<8x128xf32>
    %19 = arith.addf %17, %18 : vector<8x128xf32>
    %20 = vector.extract_strided_slice %19 {offsets = [0, 0], sizes = [8, 8], strides = [1, 1]} : vector<8x128xf32> to vector<8x8xf32>
    %c0_13 = arith.constant 0 : index
    %c0_14 = arith.constant 0 : index
    %21 = vector.load %arg4[%c0_13, %c0_14] : memref<8x8xf32, #tpu.memory_space<vmem>>, vector<8x8xf32>
    tpu.vector_store %arg4[%c0_13, %c0_14], %20 {strides = array<i32>} : memref<8x8xf32, #tpu.memory_space<vmem>>, vector<8x8xf32>,
    return
  }
  func.func @transform_0(%arg0: i32) -> (i32, i32) {
    %c0_i32 = arith.constant 0 : i32
    %c0_i32_0 = arith.constant 0 : i32
    return %arg0, %c0_i32 : i32, i32
  }
  func.func @transform_1(%arg0: i32) -> (i32, i32) {
    %c0_i32 = arith.constant 0 : i32
    %c0_i32_0 = arith.constant 0 : i32
    %c0_i32_1 = arith.constant 0 : i32
    return %c0_i32, %c0_i32_0 : i32, i32
  }
  func.func @transform_2(%arg0: i32) -> (i32, i32) {
    %c0_i32 = arith.constant 0 : i32
    %c0_i32_0 = arith.constant 0 : i32
    %c0_i32_1 = arith.constant 0 : i32
    return %c0_i32, %c0_i32_0 : i32, i32
  }
  func.func @transform_3(%arg0: i32) -> (i32, i32) {
    %c0_i32 = arith.constant 0 : i32
    %c0_i32_0 = arith.constant 0 : i32
    return %arg0, %c0_i32 : i32, i32
  }
}

</mosaic_0001>

<bundles_post_ra>
// kernel: tpu_custom_call.1
= control target key start
LH: loop header
LB: loop body
LE: loop exit
PB: predicated region body
PF: predicated region fallthrough
CT: control target
= control target key end

     0   :  { %8 = vsyncpa [#allocation3], 0  ;;  %s335_s0 = inlined_call_operand.hbm [shape: f32[8,8], index: 0, kind: input, shape index: {}]   ;;  %s336_s1 = inlined_call_operand.hbm [shape: f32[264,128], index: 1, kind: input, shape index: {}]   ;;  %s337_s2 = inlined_call_operand.hbm [shape: f32[8,128], index: 2, kind: input, shape index: {}]   ;;  %s338_s3 = inlined_call_operand.hbm [shape: f32[8,8], index: 3, kind: output, shape index: {}]  }
   0x1   :  { %9 = vsyncpa [#allocation6], 0  ;;  %s26_s14 = sshll.u32 %s336_s1, 4  ;;  %s27_s14 = int_to_ptr.hbm [resolvable:$true] %s26_s14 }
   0x2   :  { %10 = vsyncpa [#allocation4], 0  ;;  %s295_s15 = smov [#allocation5]   ;;  %s16_s19 = sshll.u32 %s335_s0, 4  ;;  %s17_s19 = int_to_ptr.hbm [resolvable:$true] %s16_s19 }
   0x3   :  { %s28_s16 = sshll.u32 %s295_s15, 4  ;;  %s296_s20 = smov 128   ;;  %s29_s16 = int_to_ptr.vmem [resolvable:$true] %s28_s16 }
   0x4   :  { %s297_s21 = smov 8   ;;  %s298_s22 = smov [#allocation2]  }
   0x5   :  { %34 = dma.hbm_to_vmem [thread:$0]  %s27_s14, 4224, %s29_s16, [#allocation6], %s296_s20, %s296_s20, %s297_s21  }
   0x6   :  { %s18_s23 = sshll.u32 %s298_s22, 4  ;;  %s40_s26 = sshll.u32 %s337_s2, 4  ;;  %s19_s23 = int_to_ptr.vmem [resolvable:$true] %s18_s23  ;;  %s41_s26 = int_to_ptr.hbm [resolvable:$true] %s40_s26 }
   0x7   :  { %21 = dma.hbm_to_vmem [thread:$0]  %s17_s19, 128, %s19_s23, [#allocation3]  }
   0x8   :  { %s299_s1 = smov [#allocation7]  }
   0x9   :  { %s42_s27 = sshll.u32 %s299_s1, 4  ;;  %s43_s27 = int_to_ptr.vmem [resolvable:$true] %s42_s27 }
   0xa   :  { %45 = dma.hbm_to_vmem [thread:$0]  %s41_s26, 128, %s43_s27, [#allocation6]  }
   0xb   :  { %289 = dma.done.wait [#allocation3], 128  }
   0xc   :  { %290 = vsyncadd [#allocation3], 4294967168 }
   0xd   :  { %291 = dma.done.wait [#allocation6], 4352  }
   0xe   :  { %292 = vsyncadd [#allocation6], 4294962944  ;;  %vm96_vm0 = vcmask 64512   ;;  %v59_v0 = vld [vmem:[#allocation5] sm:$0xff]  ;;  %v58_v1 = vld [vmem:[#allocation2] sm:$0xff]  ;;  %s300_s0 = smov [#allocation8]  }
   0xf   :  { %v75_v2 = vld [vmem:[#allocation5 + $0x80] sm:$0xff]  ;;  %115 = vmatpush.msra.mxu0 %v59_v0  ;;  %v74_v3 = vld [vmem:[#allocation5 + $0x78] sm:$0xff]  ;;  %v73_v4 = vld [vmem:[#allocation5 + $0x70] sm:$0xff]  ;;  %s170_s2 = sshll.u32 %s300_s0, 4  ;;  %s172_s30 = sshll.u32 %s338_s3, 4  ;;  %s171_s2 = int_to_ptr.vmem [resolvable:$true] %s170_s2  ;;  %s173_s30 = int_to_ptr.hbm [resolvable:$true] %s172_s30 }
  0x10   :  { %122 = vmatpush.msra.mxu1 %v75_v2  ;;  %183 = vmatmul.msk.f32.vlgmr.msra.gmra.mxu0 %vm96_vm0, %v58_v1  ;;  %v72_v5 = vld [vmem:[#allocation5 + $0x68] sm:$0xff]  ;;  %v71_v6 = vld [vmem:[#allocation5 + $0x60] sm:$0xff]  ;;  %v70_v7 = vld [vmem:[#allocation5 + $0x58] sm:$0xff] }
  0x11   :  { %v69_v8 = vld [vmem:[#allocation5 + $0x50] sm:$0xff]  ;;  %v68_v9 = vld [vmem:[#allocation5 + $0x48] sm:$0xff]  ;;  %v67_v10 = vld [vmem:[#allocation5 + $0x40] sm:$0xff] }
  0x12   :  { %123 = vmatpush.msra.mxu1 %v74_v3  ;;  %v66_v11 = vld [vmem:[#allocation5 + $0x38] sm:$0xff]  ;;  %v65_v12 = vld [vmem:[#allocation5 + $0x30] sm:$0xff]  ;;  %v64_v13 = vld [vmem:[#allocation5 + $0x28] sm:$0xff] }
  0x13   :  { %v63_v14 = vld [vmem:[#allocation5 + $0x20] sm:$0xff]  ;;  %v62_v15 = vld [vmem:[#allocation5 + $0x18] sm:$0xff]  ;;  %v61_v16 = vld [vmem:[#allocation5 + $0x10] sm:$0xff] }
  0x14   :  { %124 = vmatpush.msra.mxu1 %v73_v4  ;;  %v60_v17 = vld [vmem:[#allocation5 + $0x8] sm:$0xff]  ;;  %v91_v18 = vld [vmem:[#allocation5 + $0x100] sm:$0xff]  ;;  %v90_v19 = vld [vmem:[#allocation5 + $0xf8] sm:$0xff] }
  0x15   :  { %144 = vmatpush.msra.mxu2 %v91_v18  ;;  %v89_v20 = vld [vmem:[#allocation5 + $0xf0] sm:$0xff]  ;;  %v88_v21 = vld [vmem:[#allocation5 + $0xe8] sm:$0xff]  ;;  %v87_v22 = vld [vmem:[#allocation5 + $0xe0] sm:$0xff] }
  0x16   :  { %125 = vmatpush.msra.mxu1 %v72_v5  ;;  %v86_v23 = vld [vmem:[#allocation5 + $0xd8] sm:$0xff]  ;;  %v85_v24 = vld [vmem:[#allocation5 + $0xd0] sm:$0xff]  ;;  %v84_v25 = vld [vmem:[#allocation5 + $0xc8] sm:$0xff] }
  0x17   :  { %145 = vmatpush.msra.mxu2 %v90_v19  ;;  %v83_v26 = vld [vmem:[#allocation5 + $0xc0] sm:$0xff]  ;;  %v82_v27 = vld [vmem:[#allocation5 + $0xb8] sm:$0xff]  ;;  %v81_v28 = vld [vmem:[#allocation5 + $0xb0] sm:$0xff] }
  0x18   :  { %126 = vmatpush.msra.mxu1 %v71_v6  ;;  %v80_v29 = vld [vmem:[#allocation5 + $0xa8] sm:$0xff]  ;;  %v79_v30 = vld [vmem:[#allocation5 + $0xa0] sm:$0xff]  ;;  %v78_v35 = vld [vmem:[#allocation5 + $0x98] sm:$0xff] }
  0x19   :  { %146 = vmatpush.msra.mxu2 %v89_v20  ;;  %v190_v31 = vld [vmem:[#allocation7] ss:$0 sm:$0xff]  ;;  %v77_v36 = vld [vmem:[#allocation5 + $0x90] sm:$0xff]  ;;  %v191_v38 = vld [vmem:[#allocation7 + $0x1] ss:$0 sm:$0xff] }
  0x1a   :  { %127 = vmatpush.msra.mxu1 %v70_v7  ;;  %v76_v37 = vld [vmem:[#allocation5 + $0x88] sm:$0xff] }
  0x1b   :  { %147 = vmatpush.msra.mxu2 %v88_v21  ;;  %v192_v42 = vld [vmem:[#allocation7 + $0x2] ss:$0 sm:$0xff] }
  0x1c   :  { %128 = vmatpush.msra.mxu1 %v69_v8 }
  0x1d   :  { %148 = vmatpush.msra.mxu2 %v87_v22 }
  0x1e   :  { %129 = vmatpush.msra.mxu1 %v68_v9 }
  0x1f   :  { %149 = vmatpush.msra.mxu2 %v86_v23 }
  0x20   :  { %130 = vmatpush.msra.mxu1 %v67_v10 }
  0x21   :  { %150 = vmatpush.msra.mxu2 %v85_v24 }
  0x22   :  { %131 = vmatpush.msra.mxu1 %v66_v11 }
  0x23   :  { %151 = vmatpush.msra.mxu2 %v84_v25 }
  0x24   :  { %132 = vmatpush.msra.mxu1 %v65_v12 }
  0x25   :  { %152 = vmatpush.msra.mxu2 %v83_v26 }
  0x26   :  { %133 = vmatpush.msra.mxu1 %v64_v13 }
  0x27   :  { %153 = vmatpush.msra.mxu2 %v82_v27 }
  0x28   :  { %134 = vmatpush.msra.mxu1 %v63_v14 }
  0x29   :  { %154 = vmatpush.msra.mxu2 %v81_v28 }
  0x2a   :  { %135 = vmatpush.msra.mxu1 %v62_v15 }
  0x2b   :  { %155 = vmatpush.msra.mxu2 %v80_v29 }
  0x2c   :  { %136 = vmatpush.msra.mxu1 %v61_v16 }
  0x2d   :  { %156 = vmatpush.msra.mxu2 %v79_v30 }
  0x2e   :  { %137 = vmatpush.msra.mxu1 %v60_v17 }
  0x2f   :  { %157 = vmatpush.msra.mxu2 %v78_v35 }
  0x31   :  { %158 = vmatpush.msra.mxu2 %v77_v36 }
  0x33   :  { %159 = vmatpush.msra.mxu2 %v76_v37 }
  0x8d   :  { %v117_v32 = vpop.f32.mrf.mxu0 }
  0x8e   :  { %v118_v33 = vadd.f32 %v190_v31, %v117_v32 }
  0x90   :  { %v120_v34 = vmax.f32 %v118_v33, 0.0 }
  0x92   :  { %138 = vmatmul.f32.vlgmr.msra.gmra.mxu1 %v120_v34 }
 0x10f   :  { %v139_v39 = vpop.f32.mrf.mxu1 }
 0x110   :  { %v140_v40 = vadd.f32 %v191_v38, %v139_v39 }
 0x112   :  { %v142_v41 = vmax.f32 %v140_v40, 0.0 }
 0x114   :  { %160 = vmatmul.f32.vlgmr.msra.gmra.mxu2 %v142_v41 }
 0x197   :  { %v161_v43 = vpop.f32.mrf.mxu2 }
 0x198   :  { %v162_v44 = vadd.f32 %v192_v42, %v161_v43 }
 0x19a   :  { %164 = vst.msk [vmem:[#allocation8] sm:$0xff] %vm96_vm0, %v162_v44 }
 0x19b   :  { %175 = dma.vmem_to_hbm [thread:$0]  %s171_s2, 128, %s173_s30, [#allocation4]  }
 0x19c   :  { %293 = dma.done.wait [#allocation4], 128  }
 0x19d   :  { %294 = vsyncadd [#allocation4], 4294967168 }
 0x19e   :  { %180 = vsyncpa [#allocation3], 1 }
 0x19f   :  { %181 = vsyncpa [#allocation6], 1 }
 0x1a0   :  { %182 = vsyncpa [#allocation4], 1 }

</bundles_post_ra>
